<compile_context>
chip_gen: v7x
topology: tpu7x:2x2x1
jax: 0.10.0
libtpu: 0.0.40
codegen_flags: <defaults>
</compile_context>

<pallas_src>
from collections import OrderedDict
from functools import partial

import jax
import jax.numpy as jnp
from jax.experimental import pallas as pl
from jax.experimental.pallas import tpu as pltpu

_LANE = 128
_SUBLANE = 8


# ----------------------------------------------------------------------------
# Pallas kernel: channel-sum of gt + sparse / range masking of the loss mask.
#   mask_sparse:  mask *= (gt.sum(channel) > 0)
#   mask_range :  mask *= (gt.sum(channel) >= lo) & (gt.sum(channel) <= hi)
# ----------------------------------------------------------------------------
def _mask_kernel(gt_ref, mask_ref, out_ref, *, do_sparse, do_range, lo, hi,
                 acc_dtype):
    # gt_ref:   (1, C, TR, 128) — channels on a leading dim, (TR,128) dense tile
    # mask_ref: (1, TR, 128)
    # out_ref:  (1, TR, 128)
    s = jnp.sum(gt_ref[...].astype(acc_dtype), axis=1)    # (1, TR, 128)
    m = mask_ref[...]

    keep = None
    if do_sparse:
        keep = s > 0
    if do_range:
        in_rng = jnp.logical_and(s >= lo, s <= hi)
        keep = in_rng if keep is None else jnp.logical_and(keep, in_rng)

    if keep is not None:
        m = m * keep.astype(m.dtype)                       # single VPU multiply
    out_ref[...] = m


# ----------------------------------------------------------------------------
# Tiling helpers
# ----------------------------------------------------------------------------
def _round_up(x, m):
    return ((x + m - 1) // m) * m


def _acc_dtype(dtype):
    """f32 accumulation for sub-32-bit floats; int32 for ints/bool."""
    if jnp.issubdtype(dtype, jnp.floating):
        return jnp.float32 if dtype.itemsize < 4 else dtype
    return jnp.int32


def _target_gt_block_bytes():
    """Per-generation target size of the gt block (kernel is HBM-bound, so
    bigger tiles amortize the ~0.35 us/step overhead; v5e gains nothing past
    ~2 MiB, v7x's 3.2 TB/s HBM wants the largest tiles)."""
    try:
        kind = jax.devices()[0].device_kind.lower()
    except Exception:
        kind = ""
    if "v5" in kind:
        return 2 << 20
    if "v6" in kind:
        return 4 << 20
    return 6 << 20                                         # v7x / unknown-newer


def _choose_row_tile(R_total, C, gt_itemsize, mask_itemsize, B,
                     target_gt_bytes, vmem_budget_bytes):
    """Row-tile (sublane axis) for (.., TR, 128) blocks.

    Budgets the *actual* double-buffered working set
        2 x (gt block + mask block + out block)
    and keeps enough grid steps for both v7x TensorCores.
    """
    if R_total <= _SUBLANE:
        return R_total                                     # full extent (legal)

    row_gt = C * _LANE * gt_itemsize                       # bytes/row, gt block
    row_mo = 2 * _LANE * mask_itemsize                     # bytes/row, mask+out

    tr = max(_SUBLANE, (target_gt_bytes // row_gt) // _SUBLANE * _SUBLANE)
    tr_cap = max(_SUBLANE,
                 (vmem_budget_bytes // (2 * (row_gt + row_mo)))
                 // _SUBLANE * _SUBLANE)
    tr = min(tr, tr_cap)

    # Best effort: keep >= ~4 total grid steps so both v7x TCs get balanced work.
    want_steps = max(1, -(-4 // B))
    if want_steps > 1:
        tr_split = max(_SUBLANE,
                       _round_up(-(-R_total // want_steps), _SUBLANE))
        tr = min(tr, tr_split)

    if tr >= R_total:
        return R_total                                     # single full-extent block
    return tr


# ----------------------------------------------------------------------------
# Wrapper: layout plumbing + pallas_call
# ----------------------------------------------------------------------------
@partial(jax.jit, static_argnames=("mask_sparse", "mask_range"))
def _apply_masks_impl(mask_nchw, gt_nchw, *, mask_sparse, mask_range):
    B, C, H, W = gt_nchw.shape
    assert mask_nchw.shape == (B, 1, H, W)
    HW = H * W
    HW_pad = _round_up(HW, _LANE)
    R_total = HW_pad // _LANE

    # NCHW is channels-major: these reshapes are layout-free; padding only
    # happens for non-128-multiple HW (sliced off after the kernel).
    gt3 = gt_nchw.reshape(B, C, HW)
    m3 = mask_nchw.reshape(B, 1, HW)
    if HW_pad != HW:
        gt3 = jnp.pad(gt3, ((0, 0), (0, 0), (0, HW_pad - HW)))
        m3 = jnp.pad(m3, ((0, 0), (0, 0), (0, HW_pad - HW)))
    gt4 = gt3.reshape(B, C, R_total, _LANE)
    m4 = m3.reshape(B, R_total, _LANE)

    gt_item = gt_nchw.dtype.itemsize
    m_item = mask_nchw.dtype.itemsize
    vmem_budget = 24 << 20                                 # total DB working set cap
    tr = _choose_row_tile(R_total, C, gt_item, m_item, B,
                          _target_gt_block_bytes(), vmem_budget)
    grid = (B, pl.cdiv(R_total, tr))

    acc_dtype = _acc_dtype(gt_nchw.dtype)
    kern = partial(
        _mask_kernel,
        do_sparse=bool(mask_sparse),
        do_range=mask_range is not None,
        lo=float(mask_range[0]) if mask_range is not None else 0.0,
        hi=float(mask_range[1]) if mask_range is not None else 0.0,
        acc_dtype=acc_dtype,
    )

    # Double-buffered working set (gt + mask + out blocks) -> explicit limit.
    working_set = 2 * (C * tr * _LANE * gt_item + 2 * tr * _LANE * m_item)
    vmem_limit = int(min(32 << 20, max(16 << 20, working_set + (4 << 20))))

    cost = pl.CostEstimate(
        flops=int(B * HW_pad * (C + 2)),
        transcendentals=0,
        bytes_accessed=int(B * HW_pad * (C * gt_item + 2 * m_item)),
    )

    out4 = pl.pallas_call(
        kern,
        out_shape=jax.ShapeDtypeStruct((B, R_total, _LANE), mask_nchw.dtype),
        grid_spec=pltpu.PrefetchScalarGridSpec(
            num_scalar_prefetch=0,
            grid=grid,
            in_specs=[
                pl.BlockSpec((1, C, tr, _LANE), lambda b, t: (b, 0, t, 0)),
                pl.BlockSpec((1, tr, _LANE), lambda b, t: (b, t, 0)),
            ],
            out_specs=pl.BlockSpec((1, tr, _LANE), lambda b, t: (b, t, 0)),
        ),
        input_output_aliases={1: 0},                       # mask -> out (same shape/dtype)
        compiler_params=pltpu.CompilerParams(
            dimension_semantics=("parallel", "parallel"),
            vmem_limit_bytes=vmem_limit),
        cost_estimate=cost,
    )(gt4, m4)

    return out4.reshape(B, HW_pad)[:, :HW].reshape(B, 1, H, W)


def apply_masks_pallas(mask_nchw, gt_nchw, *, mask_sparse=False, mask_range=None):
    """Runs the sparse/range masking hot path in a Pallas TPU kernel.

    mask_nchw: (B, 1, H, W) mask
    gt_nchw:   (B, C, H, W) ground truth
    returns:   (B, 1, H, W) updated mask
    """
    mr = None if mask_range is None else (float(mask_range[0]), float(mask_range[1]))
    return _apply_masks_impl(mask_nchw, gt_nchw,
                             mask_sparse=bool(mask_sparse), mask_range=mr)


# ----------------------------------------------------------------------------
# Minimal config shim (mirrors cfg.has(key, default))
# ----------------------------------------------------------------------------
class Cfg:
    def __init__(self, **kw):
        self._d = dict(kw)

    def has(self, key, default=None):
        return self._d.get(key, default)


def _is_list(x):
    return isinstance(x, (list, tuple))


# ----------------------------------------------------------------------------
# BaseLoss — JAX version. Scalar logic is plain Python; masking uses Pallas.
# ----------------------------------------------------------------------------
class BaseLoss:
    def __init__(self, cfg=None):
        self.losses = OrderedDict()
        self.blocks = OrderedDict()
        if cfg is not None:
            self.gamma = cfg.has('gamma', 1.0)
            self.weight = cfg.has('weight', 1.0)
            self.scales = cfg.has('scales', 99)
            self.flag_mask_sparse = cfg.has('mask_sparse', False)
            self.flag_mask_range = cfg.has('mask_range', None)
            self.flag_fade_in = cfg.has('fade_in', None)
            self.flag_fade_out = cfg.has('fade_out', None)

    # ----- scalar schedule logic (pure Python, no tensors) -----------------
    def fade_in(self, epoch=None):
        if epoch is None or self.flag_fade_in is None:
            return 1.0
        if not _is_list(self.flag_fade_in):
            st, fn = (1, self.flag_fade_in)
        elif len(self.flag_fade_in) == 1:
            st, fn = (1, self.flag_fade_in[1])  # mirrors original module's indexing
        else:
            st, fn = self.flag_fade_in
        if epoch < st:
            return 0.0
        if epoch >= fn:
            return 1.0
        return 1.0 - (fn - epoch) / (fn - st + 1)

    def fade_out(self, epoch):
        if self.flag_fade_out is None:
            return 1.0
        if not _is_list(self.flag_fade_out):
            st, fn = (1, self.flag_fade_out)
        elif len(self.flag_fade_out) == 1:
            st, fn = (1, self.flag_fade_out[0])
        else:
            st, fn = self.flag_fade_out[:2]
        final = self.flag_fade_out[2] if (_is_list(self.flag_fade_out)
                                          and len(self.flag_fade_out) == 3) else 0.0
        if epoch < st:
            return 1.0
        if epoch >= fn:
            return final
        return (1.0 - final) * (fn - epoch) / (fn - st + 1) + final

    def get_weights(self, scales, epoch=None):
        fi, fo = self.fade_in(epoch), self.fade_out(epoch)
        return [fi * fo * self.weight * self.gamma ** i for i in range(scales)]

    def get_scales(self, scales):
        while isinstance(scales, dict):
            scales = list(scales.values())[0]
        return min(self.scales, len(scales))

    # ----- interpolation (glue) --------------------------------------------
    # TODO(synk): nearest/bilinear resize kept as jax.image.resize glue; a
    # dedicated Pallas gather/interp kernel is out of scope for this base class.
    @staticmethod
    def interp(dst, src, method):
        if dst is None or dst.ndim == 3:
            return dst
        assert dst.ndim == src.ndim
        if dst.ndim == 4 and dst.shape != src.shape:
            is_bool = dst.dtype == jnp.bool_
            d = dst.astype(jnp.float32) if is_bool else dst
            d = jax.image.resize(d, (d.shape[0], d.shape[1],
                                     src.shape[2], src.shape[3]), method=method)
            d = d.astype(jnp.bool_) if is_bool else d
            return d
        return dst

    def interp_bilinear(self, dst, src):
        return self.interp(dst, src, 'bilinear')

    def interp_nearest(self, dst, src):
        return self.interp(dst, src, 'nearest')

    # ----- masking hot path: Pallas kernel ----------------------------------
    def mask_sparse(self, mask, gt):
        if mask is None:
            return mask
        if self.flag_mask_sparse:
            return apply_masks_pallas(mask, gt, mask_sparse=True, mask_range=None)
        return mask

    def mask_range(self, mask, gt):
        if mask is None or gt is None:
            return mask
        if self.flag_mask_range is None:
            return mask
        return apply_masks_pallas(mask, gt, mask_sparse=False,
                                  mask_range=self.flag_mask_range)

    def apply_masks(self, mask, gt):
        """Fused sparse+range masking in a single Pallas pass."""
        if mask is None or gt is None:
            return mask
        if not self.flag_mask_sparse and self.flag_mask_range is None:
            return mask
        return apply_masks_pallas(mask, gt,
                                  mask_sparse=self.flag_mask_sparse,
                                  mask_range=self.flag_mask_range)

    # ----- flatten (glue) ----------------------------------------------------
    @staticmethod
    def flatten(pred, gt, mask=None, soft_mask=None, logvar=None):
        def to2d(x):
            if x is None:
                return None
            if x.ndim == 4:
                x = jnp.transpose(x, (0, 2, 3, 1))
            return x.reshape(-1, x.shape[-1])

        pred, gt = to2d(pred), to2d(gt)
        mask = None if mask is None else to2d(mask).reshape(-1)
        soft_mask = None if soft_mask is None else to2d(soft_mask).reshape(-1)
        logvar = None if logvar is None else to2d(logvar).reshape(-1)
        return pred, gt, mask, soft_mask, logvar

    def forward(self, *args, **kwargs):
        raise NotImplementedError('Forward not implemented for BaseLoss')


# ----------------------------------------------------------------------------
# Pure-JAX reference for the masking hot path (for verification)
# ----------------------------------------------------------------------------
def _ref_masks(mask, gt, mask_sparse, mask_range):
    s = jnp.sum(gt.astype(_acc_dtype(gt.dtype)), axis=1, keepdims=True)
    m = mask
    if mask_sparse:
        m = m * (s > 0).astype(m.dtype)
    if mask_range is not None:
        m = m * ((s >= mask_range[0]) & (s <= mask_range[1])).astype(m.dtype)
    return m


if __name__ == "__main__":
    key = jax.random.PRNGKey(0)
    k1, k2, k3 = jax.random.split(key, 3)

    B, C, H, W = 2, 4, 16, 16  # small NCHW shapes
    # gt with some all-zero pixels so mask_sparse is exercised
    gt = jax.random.uniform(k1, (B, C, H, W), dtype=jnp.float32)
    zero_pix = jax.random.bernoulli(k2, 0.3, (B, 1, H, W))
    gt = gt * (1.0 - zero_pix.astype(jnp.float32))
    mask = jnp.ones((B, 1, H, W), dtype=jnp.float32)

    cfg = Cfg(gamma=0.5, weight=2.0, scales=4,
              mask_sparse=True, mask_range=(0.5, 3.0),
              fade_in=5, fade_out=[10, 20, 0.1])
    loss = BaseLoss(cfg)

    # scalar schedule checks (plain Python)
    _ = loss.get_weights(loss.get_scales([gt, gt, gt]), epoch=7)

    # Pallas-fused masking hot path
    out = jax.block_until_ready(loss.apply_masks(mask, gt))
    ref = _ref_masks(mask, gt, True, (0.5, 3.0))
    assert out.shape == (B, 1, H, W)
    assert jnp.allclose(out, ref, atol=1e-6), "Pallas mask kernel mismatch"

    # also exercise the individual paths
    m1 = jax.block_until_ready(loss.mask_sparse(mask, gt))
    m2 = jax.block_until_ready(loss.mask_range(mask, gt))
    assert jnp.allclose(m1, _ref_masks(mask, gt, True, None), atol=1e-6)
    assert jnp.allclose(m2, _ref_masks(mask, gt, False, (0.5, 3.0)), atol=1e-6)

    # odd (non-128-multiple) spatial shape + B=1 exercises the pad-to-lane path
    B2, C2, H2, W2 = 1, 3, 20, 13
    gt_b = jax.random.uniform(k3, (B2, C2, H2, W2), dtype=jnp.float32) * 2.0
    mask_b = jnp.ones((B2, 1, H2, W2), dtype=jnp.float32)
    out_b = jax.block_until_ready(
        apply_masks_pallas(mask_b, gt_b, mask_sparse=True, mask_range=(0.5, 3.0)))
    ref_b = _ref_masks(mask_b, gt_b, True, (0.5, 3.0))
    assert jnp.allclose(out_b, ref_b, atol=1e-6), "Pallas mask kernel mismatch (odd shape)"

    # bf16 gt exercises the float32-accumulation path
    gt_h = gt.astype(jnp.bfloat16)
    out_h = jax.block_until_ready(
        apply_masks_pallas(mask, gt_h, mask_sparse=True, mask_range=(0.5, 3.0)))
    ref_h = _ref_masks(mask, gt_h, True, (0.5, 3.0))
    assert jnp.allclose(out_h, ref_h, atol=1e-6), "Pallas mask kernel mismatch (bf16)"

    # flatten glue sanity
    p2, g2, mflat, _, _ = BaseLoss.flatten(gt, gt, out)
    assert p2.shape == (B * H * W, C) and mflat.shape == (B * H * W,)

    print("KERNEL_OK")
</pallas_src>

<mosaic_0001>
module attributes {stable_mosaic.version = 11 : i64} {
  func.func @_mask_kernel(%arg0: i32, %arg1: i32, %arg2: memref<1x4x2x128xf32, #tpu.memory_space<vmem>>, %arg3: memref<1x2x128xf32, #tpu.memory_space<vmem>>, %arg4: memref<1x2x128xf32, #tpu.memory_space<vmem>>) attributes {dimension_semantics = [#tpu.dimension_semantics<parallel>, #tpu.dimension_semantics<parallel>], iteration_bounds = array<i64: 2, 1>, scalar_prefetch = 0 : i64, scratch_operands = 0 : i64, tpu.core_type = #tpu.core_type<tc>, window_params = [{transform_indices = @transform_0, window_bounds = array<i64: 1, 4, 2, 128>}, {transform_indices = @transform_1, window_bounds = array<i64: 1, 2, 128>}, {transform_indices = @transform_2, window_bounds = array<i64: 1, 2, 128>}]} {
    %c0 = arith.constant 0 : index
    %c0_0 = arith.constant 0 : index
    %c0_1 = arith.constant 0 : index
    %c0_2 = arith.constant 0 : index
    %0 = vector.load %arg2[%c0, %c0_0, %c0_1, %c0_2] : memref<1x4x2x128xf32, #tpu.memory_space<vmem>>, vector<1x4x2x128xf32>
    %cst = arith.constant dense<0.000000e+00> : vector<1x2x128xf32>
    %1 = vector.multi_reduction <add>, %0, %cst [1] : vector<1x4x2x128xf32> to vector<1x2x128xf32>
    %c0_3 = arith.constant 0 : index
    %c0_4 = arith.constant 0 : index
    %c0_5 = arith.constant 0 : index
    %2 = vector.load %arg3[%c0_3, %c0_4, %c0_5] : memref<1x2x128xf32, #tpu.memory_space<vmem>>, vector<1x2x128xf32>
    %cst_6 = arith.constant 0.000000e+00 : f32
    %3 = vector.broadcast %cst_6 : f32 to vector<1x2x128xf32>
    %4 = arith.cmpf ogt, %1, %3 : vector<1x2x128xf32>
    %cst_7 = arith.constant 5.000000e-01 : f32
    %5 = vector.broadcast %cst_7 : f32 to vector<1x2x128xf32>
    %6 = arith.cmpf oge, %1, %5 : vector<1x2x128xf32>
    %cst_8 = arith.constant 3.000000e+00 : f32
    %7 = vector.broadcast %cst_8 : f32 to vector<1x2x128xf32>
    %8 = arith.cmpf ole, %1, %7 : vector<1x2x128xf32>
    %9 = arith.andi %6, %8 : vector<1x2x128xi1>
    %10 = arith.andi %4, %9 : vector<1x2x128xi1>
    %11 = arith.extui %10 : vector<1x2x128xi1> to vector<1x2x128xi32>
    %12 = arith.sitofp %11 : vector<1x2x128xi32> to vector<1x2x128xf32>
    %13 = arith.mulf %2, %12 : vector<1x2x128xf32>
    %c0_9 = arith.constant 0 : index
    %c0_10 = arith.constant 0 : index
    %c0_11 = arith.constant 0 : index
    %14 = vector.load %arg4[%c0_9, %c0_10, %c0_11] : memref<1x2x128xf32, #tpu.memory_space<vmem>>, vector<1x2x128xf32>
    tpu.vector_store %arg4[%c0_9, %c0_10, %c0_11], %13 {strides = array<i32>} : memref<1x2x128xf32, #tpu.memory_space<vmem>>, vector<1x2x128xf32>,
    return
  }
  func.func @transform_0(%arg0: i32, %arg1: i32) -> (i32, i32, i32, i32) {
    %c0_i32 = arith.constant 0 : i32
    %c0_i32_0 = arith.constant 0 : i32
    %c0_i32_1 = arith.constant 0 : i32
    return %arg0, %c0_i32, %arg1, %c0_i32_0 : i32, i32, i32, i32
  }
  func.func @transform_1(%arg0: i32, %arg1: i32) -> (i32, i32, i32) {
    %c0_i32 = arith.constant 0 : i32
    %c0_i32_0 = arith.constant 0 : i32
    return %arg0, %arg1, %c0_i32 : i32, i32, i32
  }
  func.func @transform_2(%arg0: i32, %arg1: i32) -> (i32, i32, i32) {
    %c0_i32 = arith.constant 0 : i32
    %c0_i32_0 = arith.constant 0 : i32
    return %arg0, %arg1, %c0_i32 : i32, i32, i32
  }
}

</mosaic_0001>

<bundles_post_ra>
// kernel: _apply_masks_impl.1
= control target key start
LH: loop header
LB: loop body
LE: loop exit
PB: predicated region body
PF: predicated region fallthrough
CT: control target
= control target key end

     0   :  { %s393_s9 = smov 0   ;;  %s395_s10 = smov 0   ;;  %s429_s0 = inlined_call_operand.vmem [shape: f32[2,4,2,128], index: 0, kind: input, shape index: {}]   ;;  %s430_s1 = inlined_call_operand.vmem [shape: f32[2,2,128], index: 1, kind: input, shape index: {}, may-alias: {1,2}]   ;;  %s431_s2 = inlined_call_operand.vmem [shape: f32[2,2,128], index: 2, kind: output, shape index: {}, may-alias: {1,2}]  }
   0x1   :  { %s397_s11 = smov 0  }
   0x2 LB: > { %s24_s12 = sadd.s32 1, %s371_s10  ;;  %p319_p0 = scmp.ge.s32.totalorder %s375_s11, 1  ;;  %s375_s11 = sphi %s397_s11, %s12_s11   ;;  %s371_s10 = sphi %s395_s10, %s433_s10   ;;  %s367_s9 = sphi %s393_s9, %s432_s9  }
   0x3   : > { %p26_p1 = scmp.ge.s32.totalorder %s24_s12, 2  ;;  %p145_p2 = scmp.lt.s32.totalorder %s375_s11, 3 }
   0x5   : > { %s435_s12 = smov (%p26_p1, %s24_s12), 0  ;;  %p146_p3 = pnand %p319_p0, %p145_p2 }
   0x6   : > { %p179_p4 = scmp.lt.s32.totalorder (!%p146_p3), %s367_s9, 1  ;;  %vm205_vm0 = vcmask (!%p146_p3), 1041408   ;;  %v377_v12 = vmov (!%p146_p3), 0.0  }
   0x7   : > { %149 = sbr.rel (%p146_p3) target bundleno = 32 (0x20), region = 28 }
   0xe   : > { %s437_s9 = smov (!%p179_p4, %s367_s9), 1 }
   0xf   : > { %s327_s13 = sshll.u32 %s437_s9, 3  ;;  %s322_s17 = sshll.u32 %s437_s9, 1 }
  0x10   : > { %s186_s16 = scalar_lea.vmem %s429_s0, %s327_s13  ;;  %s193_s20 = scalar_lea.vmem %s430_s1, %s322_s17 }
  0x11   : > { %v201_v0 = vld [vmem:[%s186_s16] sm:$0x3]  ;;  %v202_v1 = vld [vmem:[%s186_s16 + $0x2] sm:$0x3]  ;;  %v203_v2 = vld [vmem:[%s186_s16 + $0x4] sm:$0x3]  ;;  %s200_s23 = scalar_lea.vmem %s431_s2, %s322_s17 }
  0x12   : > { %v204_v3 = vld [vmem:[%s186_s16 + $0x6] sm:$0x3]  ;;  %v206_v4 = vsel %vm205_vm0, %v201_v0, 0.0  ;;  %v207_v5 = vsel %vm205_vm0, %v202_v1, 0.0  ;;  %v209_v6 = vsel %vm205_vm0, %v203_v2, 0.0 }
  0x13   : > { %v208_v7 = vadd.f32 %v207_v5, %v206_v4  ;;  %v211_v8 = vsel %vm205_vm0, %v204_v3, 0.0  ;;  %v213_v11 = vld [vmem:[%s193_s20] sm:$0x3] }
  0x15   : > { %v210_v9 = vadd.f32 %v209_v6, %v208_v7 }
  0x17   : > { %v212_v10 = vadd.f32 %v211_v8, %v210_v9 }
  0x19   : > { %vm214_vm1 = vcmp.gt.f32.partialorder %v212_v10, 0.0  ;;  %vm215_vm2 = vcmp.ge.f32.partialorder %v212_v10, 0.5  ;;  %vm216_vm3 = vcmp.le.f32.partialorder %v212_v10, 3.0 }
  0x1a   : > { %vm217_vm4 = vmand %vm215_vm2, %vm216_vm3 }
  0x1b   : > { %vm218_vm5 = vmand %vm214_vm1, %vm217_vm4 }
  0x1c   : > { %v324_v13 = vsel %vm218_vm5, 1.0, %v377_v12 }
  0x1d   : > { %v221_v14 = vmul.f32 %v324_v13, %v213_v11 }
  0x1f   : > { %222 = vst [vmem:[%s200_s23] sm:$0x3] %v221_v14 }
  0x20 PF: > { %s12_s11 = sadd.s32 1, %s375_s11   ;;  %s432_s9 = smov %s371_s10 }
  0x21   : > { %p9_p5 = scmp.ge.s32.totalorder %s12_s11, 4   ;;  %s433_s10 = smov %s435_s12 }
  0x23   :  { %11 = sbr.rel (!%p9_p5) target bundleno = 2 (0x2), region = 61 }

</bundles_post_ra>
